<compile_context>
chip_gen: v5e
topology: v5e:2x2
jax: 0.10.0
libtpu: 0.0.40
codegen_flags: <defaults>
</compile_context>

<pallas_src>
import functools

import jax
import jax.numpy as jnp
from jax.experimental import pallas as pl
from jax.experimental.pallas import tpu as pltpu


LANE = 128        # TPU lane width: pad small feature/class dims to this for dense stores
BIG_TILE = 512    # preferred node-tile (~85% of HBM roofline per measured data)


def _round_up(x, m):
    return ((x + m - 1) // m) * m


def _pick_padding(n):
    """Padded node count + tile size so both grid axes tile evenly, (8,128)-aligned."""
    if n <= BIG_TILE:
        n_pad = _round_up(n, LANE)
        return n_pad, n_pad                     # single block per axis
    n_pad = _round_up(n, BIG_TILE)
    return n_pad, BIG_TILE


def _pad2d(a, rows, cols, dtype=None):
    r, c = a.shape
    out = jnp.pad(a, ((0, rows - r), (0, cols - c)))
    return out.astype(dtype) if dtype is not None else out


# ----------------------------- Pallas kernels -------------------------------

def _pagnn_conv_relu_kernel(adj_ref, cat_ref, w_ref, b_ref, out_ref, acc_ref,
                            *, num_features):
    """PaGNNConv (masked partial aggregation) + linear + bias + fused relu."""
    k = pl.program_id(1)

    @pl.when(k == 0)
    def _():
        acc_ref[...] = jnp.zeros_like(acc_ref)

    # One MXU pass accumulates BOTH numerator A@(x*mask) and denominator A@mask
    # (features concatenated on the lane axis).
    acc_ref[...] += jnp.dot(adj_ref[...], cat_ref[...],
                            preferred_element_type=jnp.float32)

    @pl.when(k == pl.num_programs(1) - 1)
    def _():
        acc = acc_ref[...]
        num = acc[:, :num_features]
        den = acc[:, num_features:]
        # divide -> EUP approximate reciprocal (frees VALU slots)
        agg = num * pl.reciprocal(jnp.maximum(den, 1e-6), approx=True)
        h = jnp.dot(agg, w_ref[...], preferred_element_type=jnp.float32) + b_ref[...]
        out_ref[...] = jnp.maximum(h, 0.0)      # fused relu


def _gcn_logsoftmax_kernel(adj_ref, h_ref, dcol_ref, drow_ref, w_ref, b_ref,
                           out_ref, acc_ref, *, num_classes):
    """GCNConv with in-kernel symmetric normalization, fused log_softmax(dim=1)."""
    k = pl.program_id(1)

    @pl.when(k == 0)
    def _():
        acc_ref[...] = jnp.zeros_like(acc_ref)

    # Fold the column-side D^{-1/2} into the streamed h tile -> no second NxN array.
    g = (h_ref[...] * dcol_ref[...]).astype(jnp.bfloat16)
    acc_ref[...] += jnp.dot(adj_ref[...], g, preferred_element_type=jnp.float32)

    @pl.when(k == pl.num_programs(1) - 1)
    def _():
        # Row-side D^{-1/2}, then the (tiny) class projection, once per row tile.
        z = jnp.dot(drow_ref[...] * acc_ref[...], w_ref[...],
                    preferred_element_type=jnp.float32) + b_ref[...]
        # log_softmax restricted to the real class lanes (rest is lane padding).
        lane = jax.lax.broadcasted_iota(jnp.int32, z.shape, 1)
        valid = lane < num_classes
        zm = jnp.where(valid, z, -jnp.inf)
        m = jnp.max(zm, axis=1, keepdims=True)
        p = jnp.where(valid, jnp.exp(zm - m), 0.0)
        lse = m + jnp.log(jnp.sum(p, axis=1, keepdims=True))
        out_ref[...] = z - lse


# ------------------------------ JAX wrappers ---------------------------------

def pagnn_conv_relu(adj_bf16, cat_bf16, w1_pad, b1_pad, *, tile):
    n_pad = adj_bf16.shape[0]
    f2 = cat_bf16.shape[1]
    f = f2 // 2
    grid = (n_pad // tile, n_pad // tile)
    kernel = functools.partial(_pagnn_conv_relu_kernel, num_features=f)
    return pl.pallas_call(
        kernel,
        out_shape=jax.ShapeDtypeStruct((n_pad, LANE), jnp.float32),
        grid_spec=pltpu.PrefetchScalarGridSpec(
            num_scalar_prefetch=0,
            grid=grid,
            in_specs=[
                pl.BlockSpec((tile, tile), lambda i, k: (i, k)),   # A_hat tile (bf16)
                pl.BlockSpec((tile, f2), lambda i, k: (k, 0)),     # [x*mask | mask]
                pl.BlockSpec((f, LANE), lambda i, k: (0, 0)),      # w1 (lane-padded)
                pl.BlockSpec((1, LANE), lambda i, k: (0, 0)),      # b1 (lane-padded)
            ],
            out_specs=pl.BlockSpec((tile, LANE), lambda i, k: (i, 0)),
            scratch_shapes=[pltpu.VMEM((tile, f2), jnp.float32)],
        ),
        compiler_params=pltpu.CompilerParams(
            dimension_semantics=("parallel", "arbitrary")),
    )(adj_bf16, cat_bf16, w1_pad, b1_pad)


def gcn_logsoftmax(adj_bf16, h_pad, d_pad, w2_pad, b2_pad, *, num_classes, tile):
    n_pad = adj_bf16.shape[0]
    grid = (n_pad // tile, n_pad // tile)
    kernel = functools.partial(_gcn_logsoftmax_kernel, num_classes=num_classes)
    return pl.pallas_call(
        kernel,
        out_shape=jax.ShapeDtypeStruct((n_pad, LANE), jnp.float32),
        grid_spec=pltpu.PrefetchScalarGridSpec(
            num_scalar_prefetch=0,
            grid=grid,
            in_specs=[
                pl.BlockSpec((tile, tile), lambda i, k: (i, k)),   # A_hat tile (bf16)
                pl.BlockSpec((tile, LANE), lambda i, k: (k, 0)),   # h (lane-padded)
                pl.BlockSpec((tile, 1), lambda i, k: (k, 0)),      # d^-1/2 (cols)
                pl.BlockSpec((tile, 1), lambda i, k: (i, 0)),      # d^-1/2 (rows)
                pl.BlockSpec((LANE, LANE), lambda i, k: (0, 0)),   # w2 (padded)
                pl.BlockSpec((1, LANE), lambda i, k: (0, 0)),      # b2 (padded)
            ],
            out_specs=pl.BlockSpec((tile, LANE), lambda i, k: (i, 0)),
            scratch_shapes=[pltpu.VMEM((tile, LANE), jnp.float32)],
        ),
        compiler_params=pltpu.CompilerParams(
            dimension_semantics=("parallel", "arbitrary")),
    )(adj_bf16, h_pad, d_pad, d_pad, w2_pad, b2_pad)


# ------------------------------ Graph glue -----------------------------------

def dense_adjacency(edge_index, num_nodes):
    """Dense A_hat = A + I from [2, E] edge_index (src, dst); aggregation src -> dst."""
    src, dst = edge_index[0], edge_index[1]
    a = jnp.zeros((num_nodes, num_nodes), jnp.float32)
    a = a.at[dst, src].add(1.0)
    a = jnp.minimum(a, 1.0)                         # de-duplicate repeated edges
    eye = jnp.eye(num_nodes, dtype=jnp.float32)
    a = a * (1.0 - eye) + eye                       # unit self-loops (no double count)
    return a


# ------------------------------- PaGNN model ---------------------------------

class PaGNNPallas:
    """num_layers=2: convs = [PaGNNConv(F, H, mask, edge_index), GCNConv(H, C)]."""

    def __init__(self, num_features, num_classes, hidden_dim, mask, key):
        k1, k2 = jax.random.split(key)

        def glorot(k, fan_in, fan_out):
            lim = (6.0 / (fan_in + fan_out)) ** 0.5
            return jax.random.uniform(k, (fan_in, fan_out), jnp.float32, -lim, lim)

        self.w1 = glorot(k1, num_features, hidden_dim)
        self.b1 = jnp.zeros((1, hidden_dim), jnp.float32)
        self.w2 = glorot(k2, hidden_dim, num_classes)
        self.b2 = jnp.zeros((1, num_classes), jnp.float32)
        self.mask = mask.astype(jnp.float32)
        self.num_classes = num_classes

        # Lane-dense (128-wide) parameter slabs; padded lanes are exact zeros so
        # they propagate zeros through relu and the class projection.
        self.w1_pad = _pad2d(self.w1, num_features, LANE)
        self.b1_pad = _pad2d(self.b1, 1, LANE)
        self.w2_pad = _pad2d(self.w2, LANE, LANE)
        self.b2_pad = _pad2d(self.b2, 1, LANE)

    def __call__(self, x, edge_index):
        n, f = x.shape
        n_pad, tile = _pick_padding(n)

        a_hat = dense_adjacency(edge_index, n)
        deg = jnp.sum(a_hat, axis=1)
        d_inv_sqrt = jax.lax.rsqrt(jnp.maximum(deg, 1e-12))

        # Single NxN operand, bf16; padded rows/cols are zero (no spurious self-loops).
        adj_bf16 = _pad2d(a_hat, n_pad, n_pad, jnp.bfloat16)
        d_pad = jnp.pad(d_inv_sqrt, (0, n_pad - n)).reshape(n_pad, 1).astype(jnp.float32)

        # Layer 1 operand: [x*mask | mask] concatenated on the lane axis (one MXU pass).
        cat = jnp.concatenate([x * self.mask, self.mask], axis=1)
        cat_bf16 = _pad2d(cat, n_pad, 2 * f, jnp.bfloat16)

        # layer 1: PaGNNConv + relu  (dropout p=0 / eval => identity)
        h_pad = pagnn_conv_relu(adj_bf16, cat_bf16, self.w1_pad, self.b1_pad, tile=tile)
        # layer 2: GCNConv (normalization folded in-kernel) + log_softmax(dim=1)
        out_pad = gcn_logsoftmax(adj_bf16, h_pad, d_pad, self.w2_pad, self.b2_pad,
                                 num_classes=self.num_classes, tile=tile)
        return out_pad[:n, :self.num_classes]


# --------------------------------- main ---------------------------------------

if __name__ == "__main__":
    N, F, H, C, E = 32, 16, 32, 8, 64

    key = jax.random.PRNGKey(0)
    kx, ke1, ke2, km, kp = jax.random.split(key, 5)

    x = jax.random.normal(kx, (N, F), jnp.float32)
    src = jax.random.randint(ke1, (E,), 0, N)
    dst = jax.random.randint(ke2, (E,), 0, N)
    edge_index = jnp.stack([src, dst], axis=0)                # [2, E]
    mask = jax.random.bernoulli(km, 0.7, (N, F)).astype(jnp.float32)

    model = PaGNNPallas(F, C, H, mask, kp)
    out = jax.block_until_ready(model(x, edge_index))

    assert out.shape == (N, C)
    # log_softmax rows must sum to ~1 in probability space
    assert jnp.allclose(jnp.sum(jnp.exp(out), axis=1), 1.0, atol=1e-4)

    # Pure-JAX f32 reference (loose tolerance: bf16 adjacency/features, approx recip).
    a_hat = dense_adjacency(edge_index, N)
    deg = jnp.sum(a_hat, axis=1)
    dinv = jax.lax.rsqrt(jnp.maximum(deg, 1e-12))
    num = a_hat @ (x * mask)
    den = a_hat @ mask
    agg = num / jnp.maximum(den, 1e-6)
    h_ref = jnp.maximum(agg @ model.w1 + model.b1, 0.0)
    a_norm = dinv[:, None] * a_hat * dinv[None, :]
    z_ref = a_norm @ h_ref @ model.w2 + model.b2
    ref = jax.nn.log_softmax(z_ref, axis=1)
    assert jnp.allclose(out, ref, atol=7e-2, rtol=7e-2), float(jnp.max(jnp.abs(out - ref)))

    print("KERNEL_OK")
</pallas_src>

<mosaic_0001>
module attributes {stable_mosaic.version = 11 : i64} {
  func.func @_pagnn_conv_relu_kernel(%arg0: i32, %arg1: i32, %arg2: memref<128x128xbf16, #tpu.memory_space<vmem>>, %arg3: memref<128x32xbf16, #tpu.memory_space<vmem>>, %arg4: memref<16x128xf32, #tpu.memory_space<vmem>>, %arg5: memref<1x128xf32, #tpu.memory_space<vmem>>, %arg6: memref<128x128xf32, #tpu.memory_space<vmem>>, %arg7: memref<128x32xf32, #tpu.memory_space<vmem>>) attributes {dimension_semantics = [#tpu.dimension_semantics<parallel>, #tpu.dimension_semantics<arbitrary>], iteration_bounds = array<i64: 1, 1>, scalar_prefetch = 0 : i64, scratch_operands = 1 : i64, tpu.core_type = #tpu.core_type<tc>, window_params = [{transform_indices = @transform_0, window_bounds = array<i64: 128, 128>}, {transform_indices = @transform_1, window_bounds = array<i64: 128, 32>}, {pipeline_mode = #tpu.pipeline_mode<synchronous>, transform_indices = @transform_2, window_bounds = array<i64: 16, 128>}, {pipeline_mode = #tpu.pipeline_mode<synchronous>, transform_indices = @transform_3, window_bounds = array<i64: 1, 128>}, {transform_indices = @transform_4, window_bounds = array<i64: 128, 128>}]} {
    %c0_i32 = arith.constant 0 : i32
    %0 = arith.cmpi eq, %arg1, %c0_i32 : i32
    %1 = arith.extui %0 : i1 to i32
    %c0_i32_0 = arith.constant 0 : i32
    %2 = arith.cmpi ne, %1, %c0_i32_0 : i32
    scf.if %2 {
      %cst_10 = arith.constant 0.000000e+00 : f32
      %12 = vector.broadcast %cst_10 : f32 to vector<128x32xf32>
      %c0_11 = arith.constant 0 : index
      %c0_12 = arith.constant 0 : index
      %13 = vector.load %arg7[%c0_11, %c0_12] : memref<128x32xf32, #tpu.memory_space<vmem>>, vector<128x32xf32>
      tpu.vector_store %arg7[%c0_11, %c0_12], %12 {strides = array<i32>} : memref<128x32xf32, #tpu.memory_space<vmem>>, vector<128x32xf32>,
    } else {
    }
    %c0 = arith.constant 0 : index
    %c0_1 = arith.constant 0 : index
    %3 = vector.load %arg7[%c0, %c0_1] : memref<128x32xf32, #tpu.memory_space<vmem>>, vector<128x32xf32>
    %c0_2 = arith.constant 0 : index
    %c0_3 = arith.constant 0 : index
    %4 = vector.load %arg2[%c0_2, %c0_3] : memref<128x128xbf16, #tpu.memory_space<vmem>>, vector<128x128xbf16>
    %c0_4 = arith.constant 0 : index
    %c0_5 = arith.constant 0 : index
    %5 = vector.load %arg3[%c0_4, %c0_5] : memref<128x32xbf16, #tpu.memory_space<vmem>>, vector<128x32xbf16>
    %cst = arith.constant dense<0.000000e+00> : vector<128x32xf32>
    %6 = tpu.matmul %4, %5, %cst {dimension_numbers = #tpu.dot_dimension_numbers<[1], [0], [0], [1], [0, 0, 1, 1], [], []>} : vector<128x128xbf16>, vector<128x32xbf16>, vector<128x32xf32> -> vector<128x32xf32>
    %7 = arith.addf %3, %6 : vector<128x32xf32>
    %c0_6 = arith.constant 0 : index
    %c0_7 = arith.constant 0 : index
    %8 = vector.load %arg7[%c0_6, %c0_7] : memref<128x32xf32, #tpu.memory_space<vmem>>, vector<128x32xf32>
    tpu.vector_store %arg7[%c0_6, %c0_7], %7 {strides = array<i32>} : memref<128x32xf32, #tpu.memory_space<vmem>>, vector<128x32xf32>,
    %c0_i32_8 = arith.constant 0 : i32
    %9 = arith.cmpi eq, %arg1, %c0_i32_8 : i32
    %10 = arith.extui %9 : i1 to i32
    %c0_i32_9 = arith.constant 0 : i32
    %11 = arith.cmpi ne, %10, %c0_i32_9 : i32
    scf.if %11 {
      %c0_10 = arith.constant 0 : index
      %c0_11 = arith.constant 0 : index
      %12 = vector.load %arg7[%c0_10, %c0_11] : memref<128x32xf32, #tpu.memory_space<vmem>>, vector<128x32xf32>
      %13 = vector.extract_strided_slice %12 {offsets = [0, 0], sizes = [128, 16], strides = [1, 1]} : vector<128x32xf32> to vector<128x16xf32>
      %14 = vector.extract_strided_slice %12 {offsets = [0, 16], sizes = [128, 16], strides = [1, 1]} : vector<128x32xf32> to vector<128x16xf32>
      %cst_12 = arith.constant 9.99999997E-7 : f32
      %15 = vector.broadcast %cst_12 : f32 to vector<128x16xf32>
      %16 = arith.maximumf %14, %15 : vector<128x16xf32>
      %17 = tpu.reciprocal %16 {approx = true} : vector<128x16xf32> -> vector<128x16xf32>
      %18 = arith.mulf %13, %17 : vector<128x16xf32>
      %c0_13 = arith.constant 0 : index
      %c0_14 = arith.constant 0 : index
      %19 = vector.load %arg4[%c0_13, %c0_14] : memref<16x128xf32, #tpu.memory_space<vmem>>, vector<16x128xf32>
      %cst_15 = arith.constant dense<0.000000e+00> : vector<128x128xf32>
      %20 = tpu.matmul %18, %19, %cst_15 {dimension_numbers = #tpu.dot_dimension_numbers<[1], [0], [0], [1], [0, 0, 1, 1], [], []>} : vector<128x16xf32>, vector<16x128xf32>, vector<128x128xf32> -> vector<128x128xf32>
      %c0_16 = arith.constant 0 : index
      %c0_17 = arith.constant 0 : index
      %21 = vector.load %arg5[%c0_16, %c0_17] : memref<1x128xf32, #tpu.memory_space<vmem>>, vector<1x128xf32>
      %22 = vector.broadcast %21 : vector<1x128xf32> to vector<128x128xf32>
      %23 = arith.addf %20, %22 : vector<128x128xf32>
      %cst_18 = arith.constant 0.000000e+00 : f32
      %24 = vector.broadcast %cst_18 : f32 to vector<128x128xf32>
      %25 = arith.maximumf %23, %24 : vector<128x128xf32>
      %c0_19 = arith.constant 0 : index
      %c0_20 = arith.constant 0 : index
      %26 = vector.load %arg6[%c0_19, %c0_20] : memref<128x128xf32, #tpu.memory_space<vmem>>, vector<128x128xf32>
      tpu.vector_store %arg6[%c0_19, %c0_20], %25 {strides = array<i32>} : memref<128x128xf32, #tpu.memory_space<vmem>>, vector<128x128xf32>,
    } else {
    }
    return
  }
  func.func @transform_0(%arg0: i32, %arg1: i32) -> (i32, i32) {
    %c0_i32 = arith.constant 0 : i32
    return %arg0, %arg1 : i32, i32
  }
  func.func @transform_1(%arg0: i32, %arg1: i32) -> (i32, i32) {
    %c0_i32 = arith.constant 0 : i32
    %c0_i32_0 = arith.constant 0 : i32
    return %arg1, %c0_i32 : i32, i32
  }
  func.func @transform_2(%arg0: i32, %arg1: i32) -> (i32, i32) {
    %c0_i32 = arith.constant 0 : i32
    %c0_i32_0 = arith.constant 0 : i32
    %c0_i32_1 = arith.constant 0 : i32
    return %c0_i32, %c0_i32_0 : i32, i32
  }
  func.func @transform_3(%arg0: i32, %arg1: i32) -> (i32, i32) {
    %c0_i32 = arith.constant 0 : i32
    %c0_i32_0 = arith.constant 0 : i32
    %c0_i32_1 = arith.constant 0 : i32
    return %c0_i32, %c0_i32_0 : i32, i32
  }
  func.func @transform_4(%arg0: i32, %arg1: i32) -> (i32, i32) {
    %c0_i32 = arith.constant 0 : i32
    %c0_i32_0 = arith.constant 0 : i32
    return %arg0, %c0_i32 : i32, i32
  }
}

</mosaic_0001>

<bundles_post_ra>
// kernel: tpu_custom_call.1
= control target key start
LH: loop header
LB: loop body
LE: loop exit
PB: predicated region body
PF: predicated region fallthrough
CT: control target
= control target key end

     0   :  { %s964_s0 = inlined_call_operand.vmem [shape: bf16[128,128], index: 0, kind: input, shape index: {}]   ;;  %s965_s1 = inlined_call_operand.vmem [shape: bf16[128,32], index: 1, kind: input, shape index: {}]   ;;  %s966_s2 = inlined_call_operand.vmem [shape: f32[16,128], index: 2, kind: input, shape index: {}]   ;;  %s967_s3 = inlined_call_operand.vmem [shape: f32[1,128], index: 3, kind: input, shape index: {}]   ;;  %s968_s4 = inlined_call_operand.hbm [shape: f32[128,128], index: 4, kind: output, shape index: {}]  }
   0x1   :  { %v661_v0 = vld [vmem:[%s965_s1 + $0x38] sm:$0xff]  ;;  %v660_v1 = vld [vmem:[%s965_s1 + $0x30] sm:$0xff] }
   0x2   :  { %183 = vmatpush.bf16.msra.mxu0 %v661_v0  ;;  %662 = vmatpush.bf16.msra.mxu2 %v661_v0 }
   0x3   :  { %9 = vsyncpa [#allocation4], 0  ;;  %v659_v2 = vld [vmem:[%s965_s1 + $0x28] sm:$0xff]  ;;  %v658_v3 = vld [vmem:[%s965_s1 + $0x20] sm:$0xff]  ;;  %vm22_vm0 = vcmask 261120   ;;  %v736_v12 = vmov 0.0  }
   0x4   :  { %v657_v4 = vld [vmem:[%s965_s1 + $0x18] sm:$0xff]  ;;  %v656_v5 = vld [vmem:[%s965_s1 + $0x10] sm:$0xff]  ;;  %v655_v6 = vld [vmem:[%s965_s1 + $0x8] sm:$0xff]  ;;  %23 = vst.msk [vmem:[#allocation2] sm:$0xff] %vm22_vm0, %v736_v12  ;;  %vm402_vm1 = vcmask 130048   ;;  %s554_s28 = sshll.u32 %s968_s4, 4  ;;  %s555_s28 = int_to_ptr.hbm [resolvable:$true] %s554_s28 }
   0x5   :  { %v654_v7 = vld [vmem:[%s965_s1] sm:$0xff]  ;;  %v647_v10 = vld [vmem:[%s964_s0 + $0x8] sm:$0xff]  ;;  %24 = vst.msk [vmem:[#allocation2 + $0x8] sm:$0xff] %vm22_vm0, %v736_v12  ;;  %v648_v13 = vld [vmem:[%s964_s0 + $0x10] sm:$0xff]  ;;  %s739_s29 = smov 128   ;;  %s740_s30 = smov 8  }
   0x6   :  { %184 = vmatpush.bf16.msra.mxu0 %v660_v1  ;;  %663 = vmatpush.bf16.msra.mxu2 %v660_v1  ;;  %v646_v8 = vld [vmem:[%s964_s0] sm:$0xff]  ;;  %v651_v11 = vld [vmem:[%s964_s0 + $0x28] sm:$0xff]  ;;  %25 = vst.msk [vmem:[#allocation2 + $0x10] sm:$0xff] %vm22_vm0, %v736_v12  ;;  %v652_v14 = vld [vmem:[%s964_s0 + $0x30] sm:$0xff] }
   0x7   :  { %v650_v9 = vld [vmem:[%s964_s0 + $0x20] sm:$0xff]  ;;  %26 = vst.msk [vmem:[#allocation2 + $0x18] sm:$0xff] %vm22_vm0, %v736_v12  ;;  %v649_v15 = vld [vmem:[%s964_s0 + $0x18] sm:$0xff] }
   0x8   :  { %27 = vst.msk [vmem:[#allocation2 + $0x20] sm:$0xff] %vm22_vm0, %v736_v12  ;;  %v653_v16 = vld [vmem:[%s964_s0 + $0x38] sm:$0xff]  ;;  %s737_s0 = smov 112  }
   0x9   :  { %28 = vst.msk [vmem:[#allocation2 + $0x28] sm:$0xff] %vm22_vm0, %v736_v12 }
   0xa   :  { %185 = vmatpush.bf16.msra.mxu0 %v659_v2  ;;  %664 = vmatpush.bf16.msra.mxu2 %v659_v2  ;;  %29 = vst.msk [vmem:[#allocation2 + $0x30] sm:$0xff] %vm22_vm0, %v736_v12 }
   0xb   :  { %30 = vst.msk [vmem:[#allocation2 + $0x38] sm:$0xff] %vm22_vm0, %v736_v12  ;;  %v39_v17 = vld [vmem:[#allocation2] sm:$0xff] }
   0xc   :  { %31 = vst.msk [vmem:[#allocation2 + $0x40] sm:$0xff] %vm22_vm0, %v736_v12  ;;  %v40_v22 = vld [vmem:[#allocation2 + $0x8] sm:$0xff] }
   0xd   :  { %32 = vst.msk [vmem:[#allocation2 + $0x48] sm:$0xff] %vm22_vm0, %v736_v12  ;;  %v41_v30 = vld [vmem:[#allocation2 + $0x10] sm:$0xff] }
   0xe   :  { %186 = vmatpush.bf16.msra.mxu0 %v658_v3  ;;  %665 = vmatpush.bf16.msra.mxu2 %v658_v3  ;;  %33 = vst.msk [vmem:[#allocation2 + $0x50] sm:$0xff] %vm22_vm0, %v736_v12  ;;  %v42_v39 = vld [vmem:[#allocation2 + $0x18] sm:$0xff] }
   0xf   :  { %34 = vst.msk [vmem:[#allocation2 + $0x58] sm:$0xff] %vm22_vm0, %v736_v12  ;;  %v43_v48 = vld [vmem:[#allocation2 + $0x20] sm:$0xff] }
  0x10   :  { %35 = vst.msk [vmem:[#allocation2 + $0x60] sm:$0xff] %vm22_vm0, %v736_v12  ;;  %v44_v59 = vld [vmem:[#allocation2 + $0x28] sm:$0xff] }
  0x11   :  { %36 = vst.msk [vmem:[#allocation2 + $0x68] sm:$0xff] %vm22_vm0, %v736_v12 }
  0x12   :  { %187 = vmatpush.bf16.msra.mxu0 %v657_v4  ;;  %666 = vmatpush.bf16.msra.mxu2 %v657_v4  ;;  %37 = vst.msk [vmem:[#allocation2 + $0x70] sm:$0xff] %vm22_vm0, %v736_v12 }
  0x13   :  { %38 = vst.msk [vmem:[#allocation2 + $0x78] sm:$0xff] %vm22_vm0, %v736_v12  ;;  %v47_v20 = vld [vmem:[#allocation2 + $0x40] sm:$0xff] }
  0x14   :  { %v48_v28 = vld [vmem:[#allocation2 + $0x48] sm:$0xff] }
  0x15   :  { %v49_v37 = vld [vmem:[#allocation2 + $0x50] sm:$0xff] }
  0x16   :  { %188 = vmatpush.bf16.msra.mxu0 %v656_v5  ;;  %667 = vmatpush.bf16.msra.mxu2 %v656_v5  ;;  %v50_v46 = vld [vmem:[#allocation2 + $0x58] sm:$0xff] }
  0x17   :  { %v51_v57 = vld [vmem:[#allocation2 + $0x60] sm:$0xff] }
  0x18   :  { %v52_v5 = vld [vmem:[#allocation2 + $0x68] sm:$0xff] }
  0x1a   :  { %189 = vmatpush.bf16.msra.mxu0 %v655_v6  ;;  %668 = vmatpush.bf16.msra.mxu2 %v655_v6 }
  0x1e   :  { %190 = vmatpush.bf16.msra.mxu0 %v654_v7  ;;  %669 = vmatpush.bf16.msra.mxu2 %v654_v7  ;;  %v45_v7 = vld [vmem:[#allocation2 + $0x30] sm:$0xff] }
  0x21   :  { %191 = vmatmul.bf16.vlgmr.msra.gmra.mxu0 %v646_v8  ;;  %211 = vmatmul.bf16.vlgmr.msra.gmra.mxu2 %v650_v9 }
  0x31   :  { %196 = vmatmul.bf16.gmra.mxu0 %v647_v10  ;;  %216 = vmatmul.bf16.gmra.mxu2 %v651_v11 }
  0x41   :  { %201 = vmatmul.bf16.gmra.mxu0 %v648_v13  ;;  %221 = vmatmul.bf16.gmra.mxu2 %v652_v14 }
  0x51   :  { %206 = vmatmul.bf16.gmra.mxu0 %v649_v15  ;;  %226 = vmatmul.bf16.gmra.mxu2 %v653_v16 }
  0x9e   :  { %v192_v18 = vpop.f32.mrf.mxu0 }
  0x9f   :  { %v232_v19 = vadd.f32 %v192_v18, %v39_v17  ;;  %v53_v17 = vld [vmem:[#allocation2 + $0x70] sm:$0xff]  ;;  %v397_v18 = vld [vmem:[%s966_s2 + $0x8] sm:$0xff] }
  0xa0   :  { %670 = vmatpush.msra.mxu3 %v397_v18  ;;  %465 = vmatpush.msra.mxu1 %v397_v18 }
  0xa1   :  { %249 = vst.msk [vmem:[#allocation2] sm:$0xff] %vm22_vm0, %v232_v19 }
  0xa4   :  { %v212_v21 = vpop.f32.mrf.mxu2 }
  0xa5   :  { %v240_v23 = vadd.f32 %v212_v21, %v47_v20  ;;  %v46_v20 = vld [vmem:[#allocation2 + $0x38] sm:$0xff] }
  0xa6   :  { %v194_v24 = vpop.f32.mrf.mxu0 }
  0xa7   :  { %257 = vst.msk [vmem:[#allocation2 + $0x40] sm:$0xff] %vm22_vm0, %v240_v23  ;;  %v233_v25 = vadd.f32 %v194_v24, %v40_v22 }
  0xa8   :  { %v832_v26 = vld [vmem:[#allocation2] sm:$0xff] }
  0xa9   :  { %250 = vst.msk [vmem:[#allocation2 + $0x8] sm:$0xff] %vm22_vm0, %v233_v25  ;;  %v284_v27 = vmax.f32 %v832_v26, 1e-06 }
  0xab   :  { %678 = vrcp.f32 %v284_v27 }
  0xac   :  { %v214_v29 = vpop.f32.mrf.mxu2 }
  0xad   :  { %v241_v31 = vadd.f32 %v214_v29, %v48_v28 }
  0xae   :  { %v197_v32 = vpop.f32.mrf.mxu0 }
  0xaf   :  { %258 = vst.msk [vmem:[#allocation2 + $0x48] sm:$0xff] %vm22_vm0, %v241_v31  ;;  %v234_v33 = vadd.f32 %v197_v32, %v41_v30  ;;  %v54_v31 = vld [vmem:[#allocation2 + $0x78] sm:$0xff]  ;;  %v890_v32 = vld [vmem:[#allocation2 + $0x40] sm:$0xff] }
  0xb0   :  { %v837_v34 = vld [vmem:[#allocation2 + $0x8] sm:$0xff] }
  0xb1   :  { %v679_v35 = vpop.eup %678  ;;  %251 = vst.msk [vmem:[#allocation2 + $0x10] sm:$0xff] %vm22_vm0, %v234_v33  ;;  %v285_v36 = vmax.f32 %v837_v34, 1e-06 }
  0xb2   :  { %332 = vrot.lane.b32.xlu0 %v679_v35, %s737_s0 }
  0xb3   :  { %680 = vrcp.f32 %v285_v36  ;;  %v292_v36 = vmax.f32 %v890_v32, 1e-06 }
  0xb4   :  { %v217_v38 = vpop.f32.mrf.mxu2 }
  0xb5   :  { %v242_v40 = vadd.f32 %v217_v38, %v49_v37 }
  0xb6   :  { %v199_v41 = vpop.f32.mrf.mxu0 }
  0xb7   :  { %259 = vst.msk [vmem:[#allocation2 + $0x50] sm:$0xff] %vm22_vm0, %v242_v40  ;;  %v235_v42 = vadd.f32 %v199_v41, %v42_v39 }
  0xb8   :  { %v843_v43 = vld [vmem:[#allocation2 + $0x10] sm:$0xff] }
  0xb9   :  { %v681_v44 = vpop.eup %680  ;;  %252 = vst.msk [vmem:[#allocation2 + $0x18] sm:$0xff] %vm22_vm0, %v235_v42  ;;  %v286_v45 = vmax.f32 %v843_v43, 1e-06 }
  0xba   :  { %334 = vrot.lane.b32.xlu0 %v681_v44, %s737_s0  ;;  %v899_v44 = vld [vmem:[#allocation2 + $0x48] sm:$0xff] }
  0xbb   :  { %682 = vrcp.f32 %v286_v45 }
  0xbc   :  { %v219_v47 = vpop.f32.mrf.mxu2 }
  0xbd   :  { %v243_v49 = vadd.f32 %v219_v47, %v50_v46 }
  0xbe   :  { %v202_v50 = vpop.f32.mrf.mxu0  ;;  %v848_v51 = vld [vmem:[#allocation2 + $0x50] sm:$0xff] }
  0xbf   :  { %260 = vst.msk [vmem:[#allocation2 + $0x58] sm:$0xff] %vm22_vm0, %v243_v49  ;;  %v236_v52 = vadd.f32 %v202_v50, %v43_v48  ;;  %v294_v53 = vmax.f32 %v848_v51, 1e-06  ;;  %v293_v49 = vmax.f32 %v899_v44, 1e-06 }
  0xc0   :  { %v852_v54 = vld [vmem:[#allocation2 + $0x18] sm:$0xff] }
  0xc1   :  { %v683_v55 = vpop.eup %682  ;;  %253 = vst.msk [vmem:[#allocation2 + $0x20] sm:$0xff] %vm22_vm0, %v236_v52  ;;  %684 = vrcp.f32 %v294_v53  ;;  %v287_v56 = vmax.f32 %v852_v54, 1e-06 }
  0xc2   :  { %336 = vrot.lane.b32.xlu1 %v683_v55, %s737_s0  ;;  %v396_v55 = vld [vmem:[%s966_s2] sm:$0xff] }
  0xc3   :  { %686 = vrcp.f32 %v287_v56  ;;  %671 = vmatpush.msra.mxu3 %v396_v55  ;;  %466 = vmatpush.msra.mxu1 %v396_v55 }
  0xc4   :  { %v222_v58 = vpop.f32.mrf.mxu2 }
  0xc5   :  { %v244_v60 = vadd.f32 %v222_v58, %v51_v57 }
  0xc6   :  { %v204_v61 = vpop.f32.mrf.mxu0  ;;  %v857_v62 = vld [vmem:[#allocation2 + $0x58] sm:$0xff] }
  0xc7   :  { %v685_v63 = vpop.eup %684  ;;  %261 = vst.msk [vmem:[#allocation2 + $0x60] sm:$0xff] %vm22_vm0, %v244_v60  ;;  %v237_v0 = vadd.f32 %v204_v61, %v44_v59  ;;  %v295_v1 = vmax.f32 %v857_v62, 1e-06 }
  0xc8   :  { %352 = vrot.lane.b32.xlu2 %v685_v63, %s737_s0  ;;  %v862_v2 = vld [vmem:[#allocation2 + $0x20] sm:$0xff] }
  0xc9   :  { %v687_v3 = vpop.eup %686  ;;  %254 = vst.msk [vmem:[#allocation2 + $0x28] sm:$0xff] %vm22_vm0, %v237_v0  ;;  %688 = vrcp.f32 %v295_v1  ;;  %v288_v4 = vmax.f32 %v862_v2, 1e-06 }
  0xca   :  { %338 = vrot.lane.b32.xlu1 %v687_v3, %s737_s0 }
  0xcb   :  { %690 = vrcp.f32 %v288_v4 }
  0xcc   :  { %v224_v6 = vpop.f32.mrf.mxu2 }
  0xcd   :  { %v245_v8 = vadd.f32 %v224_v6, %v52_v5 }
  0xce   :  { %v207_v9 = vpop.f32.mrf.mxu0  ;;  %v867_v10 = vld [vmem:[#allocation2 + $0x60] sm:$0xff] }
  0xcf   :  { %v689_v11 = vpop.eup %688  ;;  %262 = vst.msk [vmem:[#allocation2 + $0x68] sm:$0xff] %vm22_vm0, %v245_v8  ;;  %v238_v12 = vadd.f32 %v207_v9, %v45_v7  ;;  %v296_v13 = vmax.f32 %v867_v10, 1e-06 }
  0xd0   :  { %354 = vrot.lane.b32.xlu0 %v689_v11, %s737_s0  ;;  %v872_v14 = vld [vmem:[#allocation2 + $0x28] sm:$0xff] }
  0xd1   :  { %v691_v15 = vpop.eup %690  ;;  %255 = vst.msk [vmem:[#allocation2 + $0x30] sm:$0xff] %vm22_vm0, %v238_v12  ;;  %692 = vrcp.f32 %v296_v13  ;;  %v289_v16 = vmax.f32 %v872_v14, 1e-06 }
  0xd2   :  { %340 = vrot.lane.b32.xlu2 %v691_v15, %s737_s0 }
  0xd3   :  { %694 = vrcp.f32 %v289_v16 }
  0xd4   :  { %v227_v19 = vpop.f32.mrf.mxu2 }
  0xd5   :  { %v246_v21 = vadd.f32 %v227_v19, %v53_v17  ;;  %v943_v19 = vld [vmem:[%s967_s3] ss:$0 sm:$0xff]  ;;  %s738_s3 = smov [#allocation3]  }
  0xd6   :  { %v209_v22 = vpop.f32.mrf.mxu0  ;;  %v880_v23 = vld [vmem:[#allocation2 + $0x68] sm:$0xff]  ;;  %s552_s25 = sshll.u32 %s738_s3, 4  ;;  %s553_s25 = int_to_ptr.vmem [resolvable:$true] %s552_s25 }
  0xd7   :  { %v693_v24 = vpop.eup %692  ;;  %263 = vst.msk [vmem:[#allocation2 + $0x70] sm:$0xff] %vm22_vm0, %v246_v21  ;;  %v239_v25 = vadd.f32 %v209_v22, %v46_v20  ;;  %v297_v27 = vmax.f32 %v880_v23, 1e-06 }
  0xd8   :  { %v884_v28 = vld [vmem:[#allocation2 + $0x30] sm:$0xff] }
  0xd9   :  { %v695_v29 = vpop.eup %694  ;;  %256 = vst.msk [vmem:[#allocation2 + $0x38] sm:$0xff] %vm22_vm0, %v239_v25  ;;  %v290_v30 = vmax.f32 %v884_v28, 1e-06  ;;  %696 = vrcp.f32 %v297_v27 }
  0xda   :  { %356 = vrot.lane.b32.xlu2 %v693_v24, %s737_s0  ;;  %342 = vrot.lane.b32.xlu1 %v695_v29, %s737_s0 }
  0xdb   :  { %698 = vrcp.f32 %v290_v30 }
  0xdc   :  { %v229_v33 = vpop.f32.mrf.mxu2  ;;  %700 = vrcp.f32 %v292_v36 }
  0xdd   :  { %v247_v35 = vadd.f32 %v229_v33, %v54_v31 }
  0xde   :  { %v893_v37 = vld [vmem:[#allocation2 + $0x70] sm:$0xff] }
  0xdf   :  { %264 = vst.msk [vmem:[#allocation2 + $0x78] sm:$0xff] %vm22_vm0, %v247_v35  ;;  %v298_v38 = vmax.f32 %v893_v37, 1e-06  ;;  %v697_v39 = vpop.eup %696 }
  0xe0   :  { %v275_v40 = vld [vmem:[#allocation2 + $0x38] sm:$0xff] }
  0xe1   :  { %v699_v41 = vpop.eup %698  ;;  %v291_v42 = vmax.f32 %v275_v40, 1e-06  ;;  %702 = vrcp.f32 %v298_v38 }
  0xe2   :  { %358 = vrot.lane.b32.xlu1 %v697_v39, %s737_s0  ;;  %344 = vrot.lane.b32.xlu0 %v699_v41, %s737_s0  ;;  %v701_v46 = vpop.eup %700 }
  0xe3   :  { %704 = vrcp.f32 %v291_v42 }
  0xe6   :  { %v283_v45 = vld [vmem:[#allocation2 + $0x78] sm:$0xff] }
  0xe7   :  { %v299_v47 = vmax.f32 %v283_v45, 1e-06  ;;  %v703_v48 = vpop.eup %702 }
  0xe9   :  { %v705_v50 = vpop.eup %704  ;;  %706 = vrcp.f32 %v299_v47 }
  0xea   :  { %346 = vrot.lane.b32.xlu2 %v705_v50, %s737_s0  ;;  %348 = vrot.lane.b32.xlu1 %v701_v46, %s737_s0  ;;  %708 = vrcp.f32 %v293_v49 }
  0xeb   :  { %360 = vrot.lane.b32.xlu0 %v703_v48, %s737_s0 }
  0xef   :  { %v707_v52 = vpop.eup %706 }
  0xf0   :  { %v709_v53 = vpop.eup %708 }
  0xf2   :  { %362 = vrot.lane.b32.xlu2 %v707_v52, %s737_s0 }
  0xf3   :  { %350 = vrot.lane.b32.xlu0 %v709_v53, %s737_s0 }
 0x122   :  { %v353_v56 = vpop.permute.xlu2 %352 }
 0x123   :  { %v390_v57 = vmul.f32 %v353_v56, %v848_v51 }
 0x124   :  { %v333_v58 = vpop.permute.xlu0 %332 }
 0x125   :  { %v380_v59 = vmul.f32 %v333_v58, %v832_v26  ;;  %640 = vmatmul.msk.f32.vlgmr.msra.gmra.mxu3 %vm402_vm1, %v390_v57 }
 0x127   :  { %630 = vmatmul.msk.f32.vlgmr.msra.gmra.mxu1 %vm402_vm1, %v380_v59 }
 0x12c   :  { %v335_v60 = vpop.permute.xlu0 %334  ;;  %v341_v3 = vpop.permute.xlu2 %340 }
 0x12d   :  { %v381_v61 = vmul.f32 %v335_v60, %v837_v34  ;;  %v384_v5 = vmul.f32 %v341_v3, %v862_v2 }
 0x12f   :  { %631 = vmatmul.msk.f32.gmra.mxu1 %vm402_vm1, %v381_v61 }
 0x134   :  { %v337_v63 = vpop.permute.xlu1 %336  ;;  %v357_v34 = vpop.permute.xlu2 %356 }
 0x135   :  { %v382_v0 = vmul.f32 %v337_v63, %v843_v43  ;;  %v392_v43 = vmul.f32 %v357_v34, %v867_v10 }
 0x137   :  { %632 = vmatmul.msk.f32.gmra.mxu1 %vm402_vm1, %v382_v0 }
 0x13c   :  { %v339_v1 = vpop.permute.xlu1 %338 }
 0x13d   :  { %v383_v51 = vmul.f32 %v339_v1, %v852_v54 }
 0x13f   :  { %633 = vmatmul.msk.f32.gmra.mxu1 %vm402_vm1, %v383_v51 }
 0x142   :  { %v355_v26 = vpop.permute.xlu0 %354 }
 0x143   :  { %v391_v4 = vmul.f32 %v355_v26, %v857_v62 }
 0x144   :  { %v347_v9 = vpop.permute.xlu2 %346 }
 0x145   :  { %641 = vmatmul.msk.f32.gmra.mxu3 %vm402_vm1, %v391_v4  ;;  %v387_v11 = vmul.f32 %v347_v9, %v275_v40 }
 0x147   :  { %634 = vmatmul.msk.f32.gmra.mxu1 %vm402_vm1, %v384_v5 }
 0x14c   :  { %v343_v6 = vpop.permute.xlu1 %342 }
 0x14d   :  { %v385_v7 = vmul.f32 %v343_v6, %v872_v14  ;;  %642 = vmatmul.msk.f32.gmra.mxu3 %vm402_vm1, %v392_v43  ;;  %v363_v14 = vpop.permute.xlu2 %362 }
 0x14e   :  { %v395_v16 = vmul.f32 %v363_v14, %v283_v45 }
 0x14f   :  { %635 = vmatmul.msk.f32.gmra.mxu1 %vm402_vm1, %v385_v7 }
 0x154   :  { %v359_v54 = vpop.permute.xlu1 %358  ;;  %v345_v8 = vpop.permute.xlu0 %344 }
 0x155   :  { %v393_v62 = vmul.f32 %v359_v54, %v880_v23  ;;  %v386_v2 = vmul.f32 %v345_v8, %v884_v28 }
 0x157   :  { %636 = vmatmul.msk.f32.gmra.mxu1 %vm402_vm1, %v386_v2  ;;  %643 = vmatmul.msk.f32.gmra.mxu3 %vm402_vm1, %v393_v62 }
 0x15c   :  { %v349_v13 = vpop.permute.xlu1 %348 }
 0x15d   :  { %v361_v10 = vpop.permute.xlu0 %360  ;;  %v388_v15 = vmul.f32 %v349_v13, %v890_v32 }
 0x15e   :  { %v394_v12 = vmul.f32 %v361_v10, %v893_v37 }
 0x15f   :  { %637 = vmatmul.msk.f32.gmra.mxu1 %vm402_vm1, %v387_v11 }
 0x160   :  { %644 = vmatmul.msk.f32.gmra.mxu3 %vm402_vm1, %v394_v12 }
 0x165   :  { %v351_v17 = vpop.permute.xlu0 %350 }
 0x166   :  { %v389_v18 = vmul.f32 %v351_v17, %v899_v44 }
 0x167   :  { %638 = vmatmul.msk.f32.gmra.mxu1 %vm402_vm1, %v388_v15 }
 0x168   :  { %645 = vmatmul.msk.f32.gmra.mxu3 %vm402_vm1, %v395_v16 }
 0x16f   :  { %639 = vmatmul.msk.f32.gmra.mxu1 %vm402_vm1, %v389_v18 }
 0x1a4   :  { %v468_v20 = vpop.f32.mrf.mxu1 }
 0x1a5   :  { %v469_v21 = vadd.f32 %v943_v19, %v468_v20 }
 0x1a7   :  { %v516_v22 = vmax.f32 %v469_v21, 0.0 }
 0x1a8   :  { %v498_v23 = vpop.f32.mrf.mxu3 }
 0x1a9   :  { %532 = vst [vmem:[#allocation3] sm:$0xff] %v516_v22  ;;  %v499_v24 = vadd.f32 %v943_v19, %v498_v23 }
 0x1ab   :  { %v526_v25 = vmax.f32 %v499_v24, 0.0 }
 0x1ac   :  { %v471_v27 = vpop.f32.mrf.mxu1 }
 0x1ad   :  { %542 = vst [vmem:[#allocation3 + $0x50] sm:$0xff] %v526_v25  ;;  %v472_v28 = vadd.f32 %v943_v19, %v471_v27 }
 0x1af   :  { %v517_v29 = vmax.f32 %v472_v28, 0.0 }
 0x1b1   :  { %533 = vst [vmem:[#allocation3 + $0x8] sm:$0xff] %v517_v29 }
 0x1b4   :  { %v474_v30 = vpop.f32.mrf.mxu1 }
 0x1b5   :  { %v475_v31 = vadd.f32 %v943_v19, %v474_v30 }
 0x1b7   :  { %v518_v32 = vmax.f32 %v475_v31, 0.0 }
 0x1b9   :  { %534 = vst [vmem:[#allocation3 + $0x10] sm:$0xff] %v518_v32 }
 0x1bc   :  { %v477_v33 = vpop.f32.mrf.mxu1 }
 0x1bd   :  { %v478_v35 = vadd.f32 %v943_v19, %v477_v33 }
 0x1bf   :  { %v519_v36 = vmax.f32 %v478_v35, 0.0 }
 0x1c1   :  { %535 = vst [vmem:[#allocation3 + $0x18] sm:$0xff] %v519_v36 }
 0x1c4   :  { %v480_v37 = vpop.f32.mrf.mxu1 }
 0x1c5   :  { %v481_v38 = vadd.f32 %v943_v19, %v480_v37 }
 0x1c7   :  { %v520_v39 = vmax.f32 %v481_v38, 0.0 }
 0x1c8   :  { %v501_v40 = vpop.f32.mrf.mxu3 }
 0x1c9   :  { %536 = vst [vmem:[#allocation3 + $0x20] sm:$0xff] %v520_v39  ;;  %v502_v41 = vadd.f32 %v943_v19, %v501_v40 }
 0x1cb   :  { %v527_v42 = vmax.f32 %v502_v41, 0.0 }
 0x1cc   :  { %v483_v44 = vpop.f32.mrf.mxu1 }
 0x1cd   :  { %543 = vst [vmem:[#allocation3 + $0x58] sm:$0xff] %v527_v42  ;;  %v484_v45 = vadd.f32 %v943_v19, %v483_v44 }
 0x1cf   :  { %v521_v46 = vmax.f32 %v484_v45, 0.0 }
 0x1d0   :  { %v504_v47 = vpop.f32.mrf.mxu3 }
 0x1d1   :  { %537 = vst [vmem:[#allocation3 + $0x28] sm:$0xff] %v521_v46  ;;  %v505_v48 = vadd.f32 %v943_v19, %v504_v47 }
 0x1d3   :  { %v528_v49 = vmax.f32 %v505_v48, 0.0 }
 0x1d4   :  { %v486_v50 = vpop.f32.mrf.mxu1 }
 0x1d5   :  { %544 = vst [vmem:[#allocation3 + $0x60] sm:$0xff] %v528_v49  ;;  %v487_v52 = vadd.f32 %v943_v19, %v486_v50 }
 0x1d7   :  { %v522_v53 = vmax.f32 %v487_v52, 0.0 }
 0x1d9   :  { %538 = vst [vmem:[#allocation3 + $0x30] sm:$0xff] %v522_v53 }
 0x1da   :  { %v507_v55 = vpop.f32.mrf.mxu3 }
 0x1db   :  { %v508_v56 = vadd.f32 %v943_v19, %v507_v55 }
 0x1dc   :  { %v489_v57 = vpop.f32.mrf.mxu1 }
 0x1dd   :  { %v529_v58 = vmax.f32 %v508_v56, 0.0  ;;  %v490_v59 = vadd.f32 %v943_v19, %v489_v57 }
 0x1df   :  { %545 = vst [vmem:[#allocation3 + $0x68] sm:$0xff] %v529_v58  ;;  %v523_v60 = vmax.f32 %v490_v59, 0.0 }
 0x1e1   :  { %539 = vst [vmem:[#allocation3 + $0x38] sm:$0xff] %v523_v60 }
 0x1e3   :  { %v510_v61 = vpop.f32.mrf.mxu3 }
 0x1e4   :  { %v511_v63 = vadd.f32 %v943_v19, %v510_v61  ;;  %v492_v0 = vpop.f32.mrf.mxu1 }
 0x1e5   :  { %v493_v1 = vadd.f32 %v943_v19, %v492_v0 }
 0x1e6   :  { %v530_v51 = vmax.f32 %v511_v63, 0.0 }
 0x1e7   :  { %v524_v3 = vmax.f32 %v493_v1, 0.0 }
 0x1e8   :  { %546 = vst [vmem:[#allocation3 + $0x70] sm:$0xff] %v530_v51 }
 0x1e9   :  { %540 = vst [vmem:[#allocation3 + $0x40] sm:$0xff] %v524_v3 }
 0x1eb   :  { %v513_v26 = vpop.f32.mrf.mxu3 }
 0x1ec   :  { %v514_v4 = vadd.f32 %v943_v19, %v513_v26  ;;  %v495_v5 = vpop.f32.mrf.mxu1 }
 0x1ed   :  { %v496_v34 = vadd.f32 %v943_v19, %v495_v5 }
 0x1ee   :  { %v531_v43 = vmax.f32 %v514_v4, 0.0 }
 0x1ef   :  { %v525_v6 = vmax.f32 %v496_v34, 0.0 }
 0x1f0   :  { %547 = vst [vmem:[#allocation3 + $0x78] sm:$0xff] %v531_v43 }
 0x1f1   :  { %541 = vst [vmem:[#allocation3 + $0x48] sm:$0xff] %v525_v6 }
 0x1f2   :  { %560 = dma.vmem_to_hbm [thread:$0]  %s553_s25, 2048, %s555_s28, [#allocation4], %s739_s29, %s739_s29, %s740_s30  }
 0x1f3   :  { %734 = dma.done.wait [#allocation4], 2048  }
 0x1f4   :  { %735 = vsyncadd [#allocation4], 4294965248 }
 0x1f5   :  { %565 = vsyncpa [#allocation4], 1 }

</bundles_post_ra>
